<compile_context>
chip_gen: v7x
topology: tpu7x:2x2x1
jax: 0.10.0
libtpu: 0.0.40
codegen_flags: <defaults>
</compile_context>

<pallas_src>
import functools

import jax
import jax.numpy as jnp
from jax.experimental import pallas as pl
from jax.experimental.pallas import tpu as pltpu


def _round_up(x, m):
    return ((x + m - 1) // m) * m


def _vmem_capacity_bytes():
    try:
        return int(pltpu.get_tpu_info().vmem_capacity_bytes)
    except Exception:
        return 64 * 1024 * 1024  # conservative fallback (v7x-sized VMEM)


def _choose_tiles(n, v, dtype, vmem_limit_bytes, block_rows, block_cols):
    """Pick (token_rows, vocab_cols) tile sizes from the VMEM budget."""
    itemsize = jnp.dtype(dtype).itemsize
    # Sublane packing: rows multiple of 8 (f32) / 16 (bf16) / 32 (int8/fp8).
    row_align = max(8, 32 // max(itemsize, 1))
    # Per-element working set: double-buffered native-dtype input tile plus
    # ~3 full-tile f32 temporaries the compiler materializes in VMEM.
    bytes_per_elem = 2 * itemsize + 12
    budget = int(vmem_limit_bytes * 0.6)          # headroom for pipeline/spill
    target_rows = 256

    # --- vocab (lane) tile ---
    if block_cols is not None:
        tv = min(int(block_cols), v)
        if tv < v:
            tv = _round_up(tv, 128)               # lane tiles: multiples of 128
            if tv >= v:
                tv = v
    else:
        tv = v
        if v > 512 and v * bytes_per_elem * target_rows > budget:
            n_chunks = -(-(v * bytes_per_elem * target_rows) // budget)
            tv = _round_up(-(-v // n_chunks), 128)
            if tv >= v:
                tv = v

    # --- token (sublane) tile ---
    if block_rows is not None:
        tm = _round_up(int(block_rows), row_align)
    else:
        tm = budget // (max(tv, 128) * bytes_per_elem)
        tm = max(row_align, (tm // row_align) * row_align)
        tm = min(tm, 1024)
    tm = min(tm, _round_up(n, row_align))
    tm = max(tm, row_align)
    return tm, tv


def _ce_kernel(x_ref, t_ref, loss_ref, m_acc, s_acc, xt_acc, sx_acc, *,
               ignore_index, label_smoothing, vocab_size, tv, mask_vocab):
    # x_ref: (TM, TV) logits chunk (native dtype), t_ref: (TM, 1) int32,
    # loss_ref: (TM, 1) f32.  Accumulators are (TM, 1) f32 VMEM scratch that
    # persist across the vocab grid axis (last, "arbitrary").
    j = pl.program_id(1)
    nv = pl.num_programs(1)

    @pl.when(j == 0)
    def _():
        m_acc[...] = jnp.full_like(m_acc, -jnp.inf)
        s_acc[...] = jnp.zeros_like(s_acc)
        xt_acc[...] = jnp.zeros_like(xt_acc)
        sx_acc[...] = jnp.zeros_like(sx_acc)

    x = x_ref[...].astype(jnp.float32)            # cast after DMA (native dtype in HBM)
    t = t_ref[...]                                # (TM, 1) int32

    # Global vocab id of each lane in this chunk.
    vid = jax.lax.broadcasted_iota(jnp.int32, x.shape, 1) + j * tv
    if mask_vocab:
        xm = jnp.where(vid < vocab_size, x, -jnp.inf)   # drop V-padding columns
    else:
        xm = x

    # --- online log-sum-exp over vocab chunks (no full logp materialized) ---
    m_old = m_acc[...]
    m_new = jnp.maximum(m_old, jnp.max(xm, axis=-1, keepdims=True))
    s_acc[...] = (s_acc[...] * jnp.exp(m_old - m_new)
                  + jnp.sum(jnp.exp(xm - m_new), axis=-1, keepdims=True))
    m_acc[...] = m_new

    # --- target logit via one-hot (no dynamic gather on the TPU vector path).
    # Ignored / out-of-range targets match nothing -> contribute 0.
    xt_acc[...] += jnp.sum(jnp.where(vid == t, x, 0.0), axis=-1, keepdims=True)

    if label_smoothing > 0.0:
        if mask_vocab:
            sx_acc[...] += jnp.sum(jnp.where(vid < vocab_size, x, 0.0),
                                   axis=-1, keepdims=True)
        else:
            sx_acc[...] += jnp.sum(x, axis=-1, keepdims=True)

    @pl.when(j == nv - 1)
    def _():
        lse = m_acc[...] + jnp.log(s_acc[...])
        nll = lse - xt_acc[...]
        if label_smoothing > 0.0:
            eps = jnp.float32(label_smoothing)
            smooth = lse - sx_acc[...] * (1.0 / float(vocab_size))
            loss = (1.0 - eps) * nll + eps * smooth
        else:
            loss = nll
        loss_ref[...] = jnp.where(t != ignore_index, loss, 0.0)


def fused_cross_entropy_loss(logits, target, *, ignore_index=-100,
                             reduction="mean", label_smoothing=0.0,
                             block_rows=None, block_cols=None,
                             vmem_limit_bytes=None):
    """Matches FusedCrossEntropyLoss.forward (single-process path)."""
    if reduction not in ("mean", "none"):
        raise NotImplementedError("Only reduction='mean' or 'none'")

    if logits.ndim == 3:
        b, s, v = logits.shape
        logits = logits.reshape(-1, v)
        target = target.reshape(-1)

    n, v = logits.shape
    target = target.astype(jnp.int32)

    if vmem_limit_bytes is None:
        # ~70% of physical VMEM: ~90 MiB on v5e/v6e (128 MiB physical),
        # ~45 MiB on v7x (64 MiB physical).
        vmem_limit_bytes = int(_vmem_capacity_bytes() * 0.7)

    tm, tv = _choose_tiles(n, v, logits.dtype, vmem_limit_bytes,
                           block_rows, block_cols)

    # Pad so the grid divides evenly.  Padded vocab columns are excluded
    # inside the kernel (vid < V mask); padded rows carry ignore_index
    # targets and are dropped below.
    n_pad = (-n) % tm
    v_pad = (-v) % tv
    if n_pad or v_pad:
        logits = jnp.pad(logits, ((0, n_pad), (0, v_pad)))
    if n_pad:
        target = jnp.pad(target, (0, n_pad), constant_values=ignore_index)
    n_total, v_total = n + n_pad, v + v_pad
    target2d = target.reshape(n_total, 1)

    kernel = functools.partial(
        _ce_kernel, ignore_index=ignore_index,
        label_smoothing=float(label_smoothing), vocab_size=v, tv=tv,
        mask_vocab=(v_pad != 0))

    loss = pl.pallas_call(
        kernel,
        out_shape=jax.ShapeDtypeStruct((n_total, 1), jnp.float32),
        grid_spec=pltpu.PrefetchScalarGridSpec(
            num_scalar_prefetch=0,
            grid=(n_total // tm, v_total // tv),
            in_specs=[
                pl.BlockSpec((tm, tv), lambda i, j: (i, j)),   # logits chunk
                pl.BlockSpec((tm, 1), lambda i, j: (i, 0)),    # targets
            ],
            out_specs=pl.BlockSpec((tm, 1), lambda i, j: (i, 0)),
            scratch_shapes=[pltpu.VMEM((tm, 1), jnp.float32)] * 4,
        ),
        compiler_params=pltpu.CompilerParams(
            dimension_semantics=("parallel", "arbitrary"),
            vmem_limit_bytes=int(vmem_limit_bytes)),
    )(logits, target2d)

    loss = loss[:n, 0]  # drop row padding -> (N,)

    if reduction == "mean":
        valid_elements = jnp.sum(target[:n] != ignore_index)
        # NOTE: like PyTorch, divides by zero (NaN/Inf) if nothing is valid.
        return jnp.sum(loss) / valid_elements.astype(jnp.float32)
    return loss  # 'none' -> per-token losses, shape (N,)

    # TODO(synk): the process_group (tensor-parallel vocab shard + all_reduce)
    # branch of the original module is not implemented; only the
    # single-process path is reproduced.


def _reference(logits, target, ignore_index, reduction, label_smoothing):
    """Pure-JAX reference mirroring F.cross_entropy semantics."""
    logits = logits.astype(jnp.float32)
    if logits.ndim == 3:
        logits = logits.reshape(-1, logits.shape[-1])
        target = target.reshape(-1)
    logp = jax.nn.log_softmax(logits, axis=-1)
    safe_t = jnp.where(target == ignore_index, 0, target)
    nll = -jnp.take_along_axis(logp, safe_t[:, None], axis=-1)[:, 0]
    if label_smoothing > 0.0:
        smooth = -jnp.mean(logp, axis=-1)
        loss = (1.0 - label_smoothing) * nll + label_smoothing * smooth
    else:
        loss = nll
    loss = jnp.where(target == ignore_index, 0.0, loss)
    if reduction == "mean":
        return jnp.sum(loss) / jnp.sum(target != ignore_index)
    return loss


if __name__ == "__main__":
    key = jax.random.PRNGKey(0)
    k1, k2, k3, k4 = jax.random.split(key, 4)
    ignore_index = -100

    # --- Test 1: f32 logits, small vocab, automatic VMEM-aware tile sizing ---
    batch, seq, vocab = 2, 8, 32
    logits = jax.random.normal(k1, (batch, seq, vocab), dtype=jnp.float32)
    target = jax.random.randint(k2, (batch, seq), 0, vocab, dtype=jnp.int32)
    target = target.at[0, 3].set(ignore_index)
    target = target.at[1, 7].set(ignore_index)

    for red in ("mean", "none"):
        got = jax.block_until_ready(fused_cross_entropy_loss(
            logits, target, ignore_index=ignore_index, reduction=red,
            label_smoothing=0.1))
        ref = _reference(logits, target, ignore_index, red, 0.1)
        assert jnp.allclose(got, ref, atol=1e-5, rtol=1e-5), (red, got, ref)

    # --- Test 2: bf16 logits, forced vocab split (online LSE) + padding on
    #     both the token and vocab axes ---
    batch, seq, vocab = 2, 9, 300
    logits2 = jax.random.normal(k3, (batch, seq, vocab), dtype=jnp.float32) * 3.0
    logits2_bf16 = logits2.astype(jnp.bfloat16)
    target2 = jax.random.randint(k4, (batch, seq), 0, vocab, dtype=jnp.int32)
    target2 = target2.at[1, 0].set(ignore_index)

    for red in ("mean", "none"):
        got = jax.block_until_ready(fused_cross_entropy_loss(
            logits2_bf16, target2, ignore_index=ignore_index, reduction=red,
            label_smoothing=0.1, block_rows=16, block_cols=128))
        ref = _reference(logits2_bf16.astype(jnp.float32), target2,
                         ignore_index, red, 0.1)
        assert jnp.allclose(got, ref, atol=1e-4, rtol=1e-4), (red, got, ref)

    print("KERNEL_OK")
</pallas_src>

<mosaic_0001>
module attributes {stable_mosaic.version = 11 : i64} {
  func.func @_ce_kernel(%arg0: i32, %arg1: i32, %arg2: memref<16x32xf32, #tpu.memory_space<vmem>>, %arg3: memref<16x1xi32, #tpu.memory_space<vmem>>, %arg4: memref<16x1xf32, #tpu.memory_space<vmem>>, %arg5: memref<16x1xf32, #tpu.memory_space<vmem>>, %arg6: memref<16x1xf32, #tpu.memory_space<vmem>>, %arg7: memref<16x1xf32, #tpu.memory_space<vmem>>, %arg8: memref<16x1xf32, #tpu.memory_space<vmem>>) attributes {dimension_semantics = [#tpu.dimension_semantics<parallel>, #tpu.dimension_semantics<arbitrary>], iteration_bounds = array<i64: 1, 1>, scalar_prefetch = 0 : i64, scratch_operands = 4 : i64, tpu.core_type = #tpu.core_type<tc>, window_params = [{transform_indices = @transform_0, window_bounds = array<i64: 16, 32>}, {transform_indices = @transform_1, window_bounds = array<i64: 16, 1>}, {transform_indices = @transform_2, window_bounds = array<i64: 16, 1>}]} {
    %c0_i32 = arith.constant 0 : i32
    %0 = arith.cmpi eq, %arg1, %c0_i32 : i32
    %1 = arith.extui %0 : i1 to i32
    %c0_i32_0 = arith.constant 0 : i32
    %2 = arith.cmpi ne, %1, %c0_i32_0 : i32
    scf.if %2 {
      %cst_26 = arith.constant 0xFF800000 : f32
      %42 = vector.broadcast %cst_26 : f32 to vector<16x1xf32>
      %c0_27 = arith.constant 0 : index
      %c0_28 = arith.constant 0 : index
      %43 = vector.load %arg5[%c0_27, %c0_28] : memref<16x1xf32, #tpu.memory_space<vmem>>, vector<16x1xf32>
      tpu.vector_store %arg5[%c0_27, %c0_28], %42 {strides = array<i32>} : memref<16x1xf32, #tpu.memory_space<vmem>>, vector<16x1xf32>,
      %cst_29 = arith.constant 0.000000e+00 : f32
      %44 = vector.broadcast %cst_29 : f32 to vector<16x1xf32>
      %c0_30 = arith.constant 0 : index
      %c0_31 = arith.constant 0 : index
      %45 = vector.load %arg6[%c0_30, %c0_31] : memref<16x1xf32, #tpu.memory_space<vmem>>, vector<16x1xf32>
      tpu.vector_store %arg6[%c0_30, %c0_31], %44 {strides = array<i32>} : memref<16x1xf32, #tpu.memory_space<vmem>>, vector<16x1xf32>,
      %cst_32 = arith.constant 0.000000e+00 : f32
      %46 = vector.broadcast %cst_32 : f32 to vector<16x1xf32>
      %c0_33 = arith.constant 0 : index
      %c0_34 = arith.constant 0 : index
      %47 = vector.load %arg7[%c0_33, %c0_34] : memref<16x1xf32, #tpu.memory_space<vmem>>, vector<16x1xf32>
      tpu.vector_store %arg7[%c0_33, %c0_34], %46 {strides = array<i32>} : memref<16x1xf32, #tpu.memory_space<vmem>>, vector<16x1xf32>,
      %cst_35 = arith.constant 0.000000e+00 : f32
      %48 = vector.broadcast %cst_35 : f32 to vector<16x1xf32>
      %c0_36 = arith.constant 0 : index
      %c0_37 = arith.constant 0 : index
      %49 = vector.load %arg8[%c0_36, %c0_37] : memref<16x1xf32, #tpu.memory_space<vmem>>, vector<16x1xf32>
      tpu.vector_store %arg8[%c0_36, %c0_37], %48 {strides = array<i32>} : memref<16x1xf32, #tpu.memory_space<vmem>>, vector<16x1xf32>,
    } else {
    }
    %c0 = arith.constant 0 : index
    %c0_1 = arith.constant 0 : index
    %3 = vector.load %arg2[%c0, %c0_1] : memref<16x32xf32, #tpu.memory_space<vmem>>, vector<16x32xf32>
    %c0_2 = arith.constant 0 : index
    %c0_3 = arith.constant 0 : index
    %4 = vector.load %arg3[%c0_2, %c0_3] : memref<16x1xi32, #tpu.memory_space<vmem>>, vector<16x1xi32>
    %5 = tpu.iota {dimensions = array<i32: 1>} : vector<16x32xi32>
    %c32_i32 = arith.constant 32 : i32
    %6 = arith.muli %arg1, %c32_i32 : i32
    %7 = vector.broadcast %6 : i32 to vector<16x32xi32>
    %8 = arith.addi %5, %7 : vector<16x32xi32>
    %c0_4 = arith.constant 0 : index
    %c0_5 = arith.constant 0 : index
    %9 = vector.load %arg5[%c0_4, %c0_5] : memref<16x1xf32, #tpu.memory_space<vmem>>, vector<16x1xf32>
    %cst = arith.constant dense<0xFF800000> : vector<16xf32>
    %10 = vector.multi_reduction <maximumf>, %3, %cst [1] : vector<16x32xf32> to vector<16xf32>
    %11 = vector.shape_cast %10 : vector<16xf32> to vector<16x1xf32>
    %12 = arith.maximumf %9, %11 : vector<16x1xf32>
    %c0_6 = arith.constant 0 : index
    %c0_7 = arith.constant 0 : index
    %13 = vector.load %arg6[%c0_6, %c0_7] : memref<16x1xf32, #tpu.memory_space<vmem>>, vector<16x1xf32>
    %14 = arith.subf %9, %12 : vector<16x1xf32>
    %15 = math.exp %14 : vector<16x1xf32>
    %16 = arith.mulf %13, %15 : vector<16x1xf32>
    %17 = vector.broadcast %12 : vector<16x1xf32> to vector<16x32xf32>
    %18 = arith.subf %3, %17 : vector<16x32xf32>
    %19 = math.exp %18 : vector<16x32xf32>
    %cst_8 = arith.constant dense<0.000000e+00> : vector<16xf32>
    %20 = vector.multi_reduction <add>, %19, %cst_8 [1] : vector<16x32xf32> to vector<16xf32>
    %21 = vector.shape_cast %20 : vector<16xf32> to vector<16x1xf32>
    %22 = arith.addf %16, %21 : vector<16x1xf32>
    %c0_9 = arith.constant 0 : index
    %c0_10 = arith.constant 0 : index
    %23 = vector.load %arg6[%c0_9, %c0_10] : memref<16x1xf32, #tpu.memory_space<vmem>>, vector<16x1xf32>
    tpu.vector_store %arg6[%c0_9, %c0_10], %22 {strides = array<i32>} : memref<16x1xf32, #tpu.memory_space<vmem>>, vector<16x1xf32>,
    %c0_11 = arith.constant 0 : index
    %c0_12 = arith.constant 0 : index
    %24 = vector.load %arg5[%c0_11, %c0_12] : memref<16x1xf32, #tpu.memory_space<vmem>>, vector<16x1xf32>
    tpu.vector_store %arg5[%c0_11, %c0_12], %12 {strides = array<i32>} : memref<16x1xf32, #tpu.memory_space<vmem>>, vector<16x1xf32>,
    %c0_13 = arith.constant 0 : index
    %c0_14 = arith.constant 0 : index
    %25 = vector.load %arg7[%c0_13, %c0_14] : memref<16x1xf32, #tpu.memory_space<vmem>>, vector<16x1xf32>
    %26 = vector.broadcast %4 : vector<16x1xi32> to vector<16x32xi32>
    %27 = arith.cmpi eq, %8, %26 : vector<16x32xi32>
    %cst_15 = arith.constant 0.000000e+00 : f32
    %28 = vector.broadcast %cst_15 : f32 to vector<16x32xf32>
    %29 = arith.select %27, %3, %28 : vector<16x32xi1>, vector<16x32xf32>
    %cst_16 = arith.constant dense<0.000000e+00> : vector<16xf32>
    %30 = vector.multi_reduction <add>, %29, %cst_16 [1] : vector<16x32xf32> to vector<16xf32>
    %31 = vector.shape_cast %30 : vector<16xf32> to vector<16x1xf32>
    %32 = arith.addf %25, %31 : vector<16x1xf32>
    %c0_17 = arith.constant 0 : index
    %c0_18 = arith.constant 0 : index
    %33 = vector.load %arg7[%c0_17, %c0_18] : memref<16x1xf32, #tpu.memory_space<vmem>>, vector<16x1xf32>
    tpu.vector_store %arg7[%c0_17, %c0_18], %32 {strides = array<i32>} : memref<16x1xf32, #tpu.memory_space<vmem>>, vector<16x1xf32>,
    %c0_19 = arith.constant 0 : index
    %c0_20 = arith.constant 0 : index
    %34 = vector.load %arg8[%c0_19, %c0_20] : memref<16x1xf32, #tpu.memory_space<vmem>>, vector<16x1xf32>
    %cst_21 = arith.constant dense<0.000000e+00> : vector<16xf32>
    %35 = vector.multi_reduction <add>, %3, %cst_21 [1] : vector<16x32xf32> to vector<16xf32>
    %36 = vector.shape_cast %35 : vector<16xf32> to vector<16x1xf32>
    %37 = arith.addf %34, %36 : vector<16x1xf32>
    %c0_22 = arith.constant 0 : index
    %c0_23 = arith.constant 0 : index
    %38 = vector.load %arg8[%c0_22, %c0_23] : memref<16x1xf32, #tpu.memory_space<vmem>>, vector<16x1xf32>
    tpu.vector_store %arg8[%c0_22, %c0_23], %37 {strides = array<i32>} : memref<16x1xf32, #tpu.memory_space<vmem>>, vector<16x1xf32>,
    %c0_i32_24 = arith.constant 0 : i32
    %39 = arith.cmpi eq, %arg1, %c0_i32_24 : i32
    %40 = arith.extui %39 : i1 to i32
    %c0_i32_25 = arith.constant 0 : i32
    %41 = arith.cmpi ne, %40, %c0_i32_25 : i32
    scf.if %41 {
      %c0_26 = arith.constant 0 : index
      %c0_27 = arith.constant 0 : index
      %42 = vector.load %arg5[%c0_26, %c0_27] : memref<16x1xf32, #tpu.memory_space<vmem>>, vector<16x1xf32>
      %c0_28 = arith.constant 0 : index
      %c0_29 = arith.constant 0 : index
      %43 = vector.load %arg6[%c0_28, %c0_29] : memref<16x1xf32, #tpu.memory_space<vmem>>, vector<16x1xf32>
      %44 = math.log %43 : vector<16x1xf32>
      %45 = arith.addf %42, %44 : vector<16x1xf32>
      %c0_30 = arith.constant 0 : index
      %c0_31 = arith.constant 0 : index
      %46 = vector.load %arg7[%c0_30, %c0_31] : memref<16x1xf32, #tpu.memory_space<vmem>>, vector<16x1xf32>
      %47 = arith.subf %45, %46 : vector<16x1xf32>
      %c0_32 = arith.constant 0 : index
      %c0_33 = arith.constant 0 : index
      %48 = vector.load %arg8[%c0_32, %c0_33] : memref<16x1xf32, #tpu.memory_space<vmem>>, vector<16x1xf32>
      %cst_34 = arith.constant 3.125000e-02 : f32
      %49 = vector.broadcast %cst_34 : f32 to vector<16x1xf32>
      %50 = arith.mulf %48, %49 : vector<16x1xf32>
      %51 = arith.subf %45, %50 : vector<16x1xf32>
      %cst_35 = arith.constant 1.000000e+00 : f32
      %cst_36 = arith.constant 1.000000e-01 : f32
      %52 = arith.subf %cst_35, %cst_36 : f32
      %53 = vector.broadcast %52 : f32 to vector<16x1xf32>
      %54 = arith.mulf %53, %47 : vector<16x1xf32>
      %cst_37 = arith.constant 1.000000e-01 : f32
      %55 = vector.broadcast %cst_37 : f32 to vector<16x1xf32>
      %56 = arith.mulf %55, %51 : vector<16x1xf32>
      %57 = arith.addf %54, %56 : vector<16x1xf32>
      %c-100_i32 = arith.constant -100 : i32
      %58 = vector.broadcast %c-100_i32 : i32 to vector<16x1xi32>
      %59 = arith.cmpi ne, %4, %58 : vector<16x1xi32>
      %cst_38 = arith.constant 0.000000e+00 : f32
      %60 = vector.broadcast %cst_38 : f32 to vector<16x1xf32>
      %61 = arith.select %59, %57, %60 : vector<16x1xi1>, vector<16x1xf32>
      %c0_39 = arith.constant 0 : index
      %c0_40 = arith.constant 0 : index
      %62 = vector.load %arg4[%c0_39, %c0_40] : memref<16x1xf32, #tpu.memory_space<vmem>>, vector<16x1xf32>
      tpu.vector_store %arg4[%c0_39, %c0_40], %61 {strides = array<i32>} : memref<16x1xf32, #tpu.memory_space<vmem>>, vector<16x1xf32>,
    } else {
    }
    return
  }
  func.func @transform_0(%arg0: i32, %arg1: i32) -> (i32, i32) {
    %c0_i32 = arith.constant 0 : i32
    return %arg0, %arg1 : i32, i32
  }
  func.func @transform_1(%arg0: i32, %arg1: i32) -> (i32, i32) {
    %c0_i32 = arith.constant 0 : i32
    %c0_i32_0 = arith.constant 0 : i32
    return %arg0, %c0_i32 : i32, i32
  }
  func.func @transform_2(%arg0: i32, %arg1: i32) -> (i32, i32) {
    %c0_i32 = arith.constant 0 : i32
    %c0_i32_0 = arith.constant 0 : i32
    return %arg0, %c0_i32 : i32, i32
  }
}

</mosaic_0001>

<bundles_post_ra>
// kernel: tpu_custom_call.1
= control target key start
LH: loop header
LB: loop body
LE: loop exit
PB: predicated region body
PF: predicated region fallthrough
CT: control target
= control target key end

     0   :  { %vm35_vm0 = vcmask 261120   ;;  %vm15_vm1 = vcmask 7168   ;;  %v173_v2 = vmov -inf   ;;  %v174_v5 = vmov 0   ;;  %s243_s0 = inlined_call_operand.vmem [shape: f32[16,32], index: 0, kind: input, shape index: {}]   ;;  %s244_s1 = inlined_call_operand.vmem [shape: s32[16,1], index: 1, kind: input, shape index: {}]   ;;  %s245_s2 = inlined_call_operand.vmem [shape: f32[16,1], index: 2, kind: output, shape index: {}]  }
   0x1   :  { %v24_v0 = vld [vmem:[%s243_s0] sm:$0xff]  ;;  %v25_v1 = vld [vmem:[%s243_s0 + $0x8] sm:$0xff]  ;;  %16 = vst.msk [vmem:[#allocation2] sm:$0xff] %vm15_vm1, %v173_v2  ;;  %17 = vst.msk [vmem:[#allocation2 + $0x8] sm:$0xff] %vm15_vm1, %v173_v2  ;;  %159 = vset.pattern.permute.xlu1 %v174_v5  ;;  %160 = vset.pattern.permute.xlu0 %v174_v5  ;;  %v175_v6 = vmov 0.0   ;;  %v28_v24 = vlaneseq }
   0x2   :  { %v36_v3 = vsel %vm35_vm0, %v24_v0, -inf  ;;  %v39_v4 = vsel %vm35_vm0, %v25_v1, -inf  ;;  %18 = vst.msk [vmem:[#allocation3] sm:$0xff] %vm15_vm1, %v175_v6  ;;  %19 = vst.msk [vmem:[#allocation3 + $0x8] sm:$0xff] %vm15_vm1, %v175_v6  ;;  %v210_v7 = vld [vmem:[%s244_s1] sm:$0xff]  ;;  %v218_v16 = vld [vmem:[%s244_s1 + $0x8] sm:$0xff] }
   0x3   :  { %37 = vmax.xlane.f32.xlu0 %v36_v3  ;;  %20 = vst.msk [vmem:[#allocation4] sm:$0xff] %vm15_vm1, %v175_v6  ;;  %21 = vst.msk [vmem:[#allocation4 + $0x8] sm:$0xff] %vm15_vm1, %v175_v6  ;;  %v107_v17 = vsel %vm35_vm0, %v24_v0, 0.0  ;;  %v29_v28 = vand.u32 127, %v28_v24  ;;  %v110_v31 = vsel %vm35_vm0, %v25_v1, 0.0  ;;  %vm146_vm4 = vcmp.ne.s32.totalorder %v210_v7, 4294967196 }
   0x4   :  { %22 = vst.msk [vmem:[#allocation5] sm:$0xff] %vm15_vm1, %v175_v6  ;;  %23 = vst.msk [vmem:[#allocation5 + $0x8] sm:$0xff] %vm15_vm1, %v175_v6  ;;  %vm147_vm5 = vcmp.ne.s32.totalorder %v218_v16, 4294967196 }
   0x7   :  { %40 = vmax.xlane.f32.xlu0 %v39_v4 }
   0x8   :  { %v33_v8 = vld [vmem:[#allocation2] sm:$0xff]  ;;  %v34_v11 = vld [vmem:[#allocation2 + $0x8] sm:$0xff] }
   0x9   :  { %v44_v43 = vld [vmem:[#allocation3] sm:$0xff]  ;;  %v45_v47 = vld [vmem:[#allocation3 + $0x8] sm:$0xff] }
   0xa   :  { %v83_v56 = vld [vmem:[#allocation4] sm:$0xff]  ;;  %v84_v60 = vld [vmem:[#allocation4 + $0x8] sm:$0xff] }
   0xb   :  { %v105_v37 = vld [vmem:[#allocation5] sm:$0xff]  ;;  %v106_v52 = vld [vmem:[#allocation5 + $0x8] sm:$0xff] }
  0x1d   :  { %86 = vperm.xlu0 %160, %v210_v7  }
  0x3c   :  { %108 = vadd.xlane.f32.xlu0 %v107_v17 }
  0x90   :  { %v38_v9 = vpop.xlane.xlu0 %37 }
  0x91   :  { %v42_v10 = vmax.f32 %v33_v8, %v38_v9 }
  0x93   :  { %v46_v12 = vsub.f32 %v33_v8, %v42_v10  ;;  %81 = vst.msk [vmem:[#allocation2] sm:$0xff] %vm15_vm1, %v42_v10  ;;  %56 = vperm.xlu1 %159, %v42_v10  }
  0x94   :  { %v41_v13 = vpop.xlane.xlu0 %40 }
  0x95   :  { %v43_v14 = vmax.f32 %v34_v11, %v41_v13  ;;  %v48_v40 = vmul.f32 1.442695, %v46_v12 }
  0x97   :  { %v47_v15 = vsub.f32 %v34_v11, %v43_v14  ;;  %82 = vst.msk [vmem:[#allocation2 + $0x8] sm:$0xff] %vm15_vm1, %v43_v14  ;;  %61 = vperm.xlu1 %159, %v43_v14  }
  0x99   :  { %v50_v41 = vmul.f32 1.442695, %v47_v15 }
  0x9a   :  { %v120_v3 = vld [vmem:[#allocation2] sm:$0xff] }
  0x9b   :  { %89 = vperm.xlu1 %159, %v218_v16  }
  0x9c   :  { %v87_v27 = vpop.permute.xlu0 %86 }
  0x9d   :  { %vm91_vm2 = vcmp.eq.s32.totalorder %v29_v28, %v87_v27 }
  0x9e   :  { %v93_v33 = vsel %vm91_vm2, %v24_v0, 0.0  ;;  %v121_v12 = vld [vmem:[#allocation2 + $0x8] sm:$0xff] }
  0x9f   :  { %v95_v34 = vsel %vm35_vm0, %v93_v33, 0.0 }
  0xc9   :  { %v109_v38 = vpop.xlane.xlu0 %108 }
  0xca   :  { %v113_v39 = vadd.f32 %v109_v38, %v105_v37 }
  0xcc   :  { %115 = vst.msk [vmem:[#allocation5] sm:$0xff] %vm15_vm1, %v113_v39 }
  0xd3   :  { %v134_v63 = vld [vmem:[#allocation5] sm:$0xff] }
  0xd4   :  { %v136_v2 = vmul.f32 0.03125, %v134_v63 }
 0x112   :  { %v57_v18 = vpop.permute.xlu1 %56 }
 0x113   :  { %v64_v19 = vsub.f32 %v24_v0, %v57_v18 }
 0x115   :  { %v66_v20 = vmul.f32 1.442695, %v64_v19 }
 0x116   :  { %v62_v21 = vpop.permute.xlu1 %61 }
 0x117   :  { %161 = vpow2.f32 %v66_v20  ;;  %v65_v22 = vsub.f32 %v25_v1, %v62_v21 }
 0x119   :  { %v68_v23 = vmul.f32 1.442695, %v65_v22 }
 0x11a   :  { %v90_v32 = vpop.permute.xlu1 %89 }
 0x11b   :  { %163 = vpow2.f32 %v68_v23  ;;  %vm92_vm3 = vcmp.eq.s32.totalorder %v29_v28, %v90_v32 }
 0x11c   :  { %v94_v35 = vsel %vm92_vm3, %v25_v1, 0.0  ;;  %165 = vpow2.f32 %v48_v40 }
 0x11d   :  { %v98_v36 = vsel %vm35_vm0, %v94_v35, 0.0  ;;  %167 = vpow2.f32 %v50_v41 }
 0x121   :  { %v162_v25 = vpop.eup %161 }
 0x122   :  { %v70_v26 = vsel %vm35_vm0, %v162_v25, 0.0 }
 0x123   :  { %71 = vadd.xlane.f32.xlu1 %v70_v26 }
 0x125   :  { %v164_v29 = vpop.eup %163 }
 0x126   :  { %v73_v30 = vsel %vm35_vm0, %v164_v29, 0.0  ;;  %v166_v42 = vpop.eup %165 }
 0x127   :  { %74 = vadd.xlane.f32.xlu1 %v73_v30  ;;  %v52_v44 = vmul.f32 %v166_v42, %v44_v43  ;;  %v168_v45 = vpop.eup %167 }
 0x128   :  { %v53_v49 = vmul.f32 %v168_v45, %v45_v47 }
 0x12b   :  { %111 = vadd.xlane.f32.xlu1 %v110_v31 }
 0x12f   :  { %96 = vadd.xlane.f32.xlu1 %v95_v34 }
 0x133   :  { %99 = vadd.xlane.f32.xlu1 %v98_v36 }
 0x1b0   :  { %v72_v46 = vpop.xlane.xlu1 %71 }
 0x1b1   :  { %v76_v48 = vadd.f32 %v72_v46, %v52_v44 }
 0x1b3   :  { %79 = vst.msk [vmem:[#allocation3] sm:$0xff] %vm15_vm1, %v76_v48 }
 0x1b4   :  { %v75_v50 = vpop.xlane.xlu1 %74 }
 0x1b5   :  { %v77_v51 = vadd.f32 %v75_v50, %v53_v49 }
 0x1b7   :  { %80 = vst.msk [vmem:[#allocation3 + $0x8] sm:$0xff] %vm15_vm1, %v77_v51 }
 0x1b8   :  { %v112_v53 = vpop.xlane.xlu1 %111 }
 0x1b9   :  { %v114_v54 = vadd.f32 %v112_v53, %v106_v52 }
 0x1ba   :  { %v122_v55 = vld [vmem:[#allocation3] sm:$0xff] }
 0x1bb   :  { %169 = vlog2.f32 %v122_v55  ;;  %116 = vst.msk [vmem:[#allocation5 + $0x8] sm:$0xff] %vm15_vm1, %v114_v54 }
 0x1bc   :  { %v97_v57 = vpop.xlane.xlu1 %96 }
 0x1bd   :  { %v101_v58 = vadd.f32 %v97_v57, %v83_v56 }
 0x1be   :  { %v123_v59 = vld [vmem:[#allocation3 + $0x8] sm:$0xff] }
 0x1bf   :  { %171 = vlog2.f32 %v123_v59  ;;  %103 = vst.msk [vmem:[#allocation4] sm:$0xff] %vm15_vm1, %v101_v58 }
 0x1c0   :  { %v100_v61 = vpop.xlane.xlu1 %99 }
 0x1c1   :  { %v102_v62 = vadd.f32 %v100_v61, %v84_v60 }
 0x1c2   :  { %v135_v8 = vld [vmem:[#allocation5 + $0x8] sm:$0xff] }
 0x1c3   :  { %104 = vst.msk [vmem:[#allocation4 + $0x8] sm:$0xff] %vm15_vm1, %v102_v62  ;;  %v137_v14 = vmul.f32 0.03125, %v135_v8 }
 0x1c5   :  { %v170_v0 = vpop.eup %169 }
 0x1c6   :  { %v125_v1 = vmul.f32 0.6931472, %v170_v0  ;;  %v130_v4 = vld [vmem:[#allocation4] sm:$0xff] }
 0x1c8   :  { %v128_v5 = vadd.f32 %v125_v1, %v120_v3 }
 0x1c9   :  { %v172_v6 = vpop.eup %171 }
 0x1ca   :  { %v127_v9 = vmul.f32 0.6931472, %v172_v6  ;;  %v132_v10 = vsub.f32 %v128_v5, %v130_v4  ;;  %v138_v11 = vsub.f32 %v128_v5, %v136_v2  ;;  %v131_v18 = vld [vmem:[#allocation4 + $0x8] sm:$0xff] }
 0x1cc   :  { %v129_v13 = vadd.f32 %v127_v9, %v121_v12  ;;  %v140_v15 = vmul.f32 0.9, %v132_v10  ;;  %v142_v17 = vmul.f32 0.1, %v138_v11 }
 0x1ce   :  { %v139_v19 = vsub.f32 %v129_v13, %v137_v14  ;;  %v144_v20 = vadd.f32 %v142_v17, %v140_v15  ;;  %v133_v21 = vsub.f32 %v129_v13, %v131_v18 }
 0x1d0   :  { %v143_v22 = vmul.f32 0.1, %v139_v19  ;;  %v148_v23 = vsel %vm146_vm4, %v144_v20, 0.0  ;;  %v141_v24 = vmul.f32 0.9, %v133_v21 }
 0x1d1   :  { %150 = vst.msk [vmem:[%s245_s2] sm:$0xff] %vm15_vm1, %v148_v23 }
 0x1d2   :  { %v145_v25 = vadd.f32 %v143_v22, %v141_v24 }
 0x1d4   :  { %v149_v26 = vsel %vm147_vm5, %v145_v25, 0.0 }
 0x1d5   :  { %151 = vst.msk [vmem:[%s245_s2 + $0x8] sm:$0xff] %vm15_vm1, %v149_v26 }

</bundles_post_ra>
